<compile_context>
chip_gen: v5e
topology: v5e:2x2
jax: 0.10.0
libtpu: 0.0.40
codegen_flags: <defaults>
</compile_context>

<pallas_src>
import functools
import math

import jax
import jax.numpy as jnp
from jax.experimental import pallas as pl
from jax.experimental.pallas import tpu as pltpu


# ---------------------------------------------------------------------------
# helpers
# ---------------------------------------------------------------------------

def _round_up(x, m):
    return ((x + m - 1) // m) * m


def _vmem_budget():
    """Return (vmem_limit_bytes, tile_budget_bytes) for this chip generation."""
    try:
        cap = int(pltpu.get_tpu_info().vmem_capacity_bytes)
    except Exception:
        cap = 64 * 1024 * 1024          # conservative fallback (covers v7x 64 MiB/TC)
    vmem_limit = (cap * 3) // 4          # ~96 MiB on v5e/v6e (128 MiB), ~48 MiB on v7x
    vmem_limit = max(32 * 1024 * 1024, min(vmem_limit, 128 * 1024 * 1024))
    tile_budget = (vmem_limit * 4) // 5  # headroom for compiler-internal scratch
    return vmem_limit, tile_budget


def _pick_row_tile(rows, bytes_per_row, tile_budget):
    """Largest multiple-of-8 row tile that fits the VMEM budget, capped so the
    grid keeps >=2 (ideally >=4) steps (lets v7x shard rows across its 2 TCs)."""
    if rows <= 8:
        return rows                      # single full block (block dim == array dim)
    tm = max(8, (tile_budget // max(1, bytes_per_row)) // 8 * 8)
    tm = min(tm, 1024)                   # beyond ~512-1024 rows the HBM roofline is saturated
    if rows >= 32:
        tm = min(tm, _round_up(pl.cdiv(rows, 4), 8))
    else:
        tm = min(tm, _round_up(pl.cdiv(rows, 2), 8))
    return tm


def _refined_reciprocal(denom):
    """EUP approximate reciprocal + one Newton step (on a (tm,1) column only)."""
    inv = pl.reciprocal(denom, approx=True)
    return inv * (2.0 - denom * inv)


# ---------------------------------------------------------------------------
# kernels
# ---------------------------------------------------------------------------

def _ssmax_oneshot_kernel(scale_ref, x_ref, o_ref):
    """softmax(x * scale) over the last axis of one (tm, N) tile."""
    scale = scale_ref[0, 0]                          # f32 scalar in SMEM
    x = x_ref[...]                                   # stay in input dtype (bf16-friendly)
    # Fold `scale` into the exp argument instead of materializing x*scale:
    #   max(scale*x) == scale*max(x) for scale >= 0, scale*min(x) otherwise.
    m_hi = jnp.max(x, axis=-1, keepdims=True)
    m_lo = jnp.min(x, axis=-1, keepdims=True)
    m = jnp.where(scale >= 0.0, m_hi, m_lo)
    e = jnp.exp((x - m).astype(jnp.float32) * scale)  # exp/sum in f32
    denom = jnp.sum(e, axis=-1, keepdims=True)
    o_ref[...] = (e * _refined_reciprocal(denom)).astype(o_ref.dtype)


def _ssmax_stats_kernel(scale_ref, x_ref, m_ref, l_ref, *, n_valid, chunk):
    """Online running max / sum-exp over N-chunks (grid axis 1 is 'arbitrary')."""
    j = pl.program_id(1)
    scale = scale_ref[0, 0]

    @pl.when(j == 0)
    def _init():
        m_ref[...] = jnp.full_like(m_ref, -jnp.inf)
        l_ref[...] = jnp.zeros_like(l_ref)

    z = x_ref[...].astype(jnp.float32) * scale        # (tm, chunk)
    if n_valid % chunk != 0:                          # mask padded tail columns
        col = jax.lax.broadcasted_iota(jnp.int32, z.shape, 1) + j * chunk
        z = jnp.where(col < n_valid, z, -jnp.inf)

    m_prev = m_ref[...]
    m_new = jnp.maximum(m_prev, jnp.max(z, axis=-1, keepdims=True))
    l_ref[...] = (l_ref[...] * jnp.exp(m_prev - m_new)
                  + jnp.sum(jnp.exp(z - m_new), axis=-1, keepdims=True))
    m_ref[...] = m_new


def _ssmax_apply_kernel(scale_ref, x_ref, m_ref, l_ref, o_ref):
    """out = exp(x*scale - m) / l for one (tm, chunk) tile."""
    scale = scale_ref[0, 0]
    inv = _refined_reciprocal(l_ref[...])
    e = jnp.exp(x_ref[...].astype(jnp.float32) * scale - m_ref[...])
    o_ref[...] = (e * inv).astype(o_ref.dtype)


# ---------------------------------------------------------------------------
# wrapper
# ---------------------------------------------------------------------------

def scalable_softmax(x, s=0.43, b=0.0, has_bias=False, dim=-1, *,
                     n_chunk=None, force_chunked=False):
    """SSMax along `dim`: softmax(x * (s*log(N) [+ b]), axis=dim)."""
    ndim = x.ndim
    axis = dim % ndim
    if axis != ndim - 1:
        x = jnp.moveaxis(x, axis, -1)

    orig_shape = x.shape
    n = orig_shape[-1]
    rows = int(math.prod(orig_shape[:-1])) if ndim > 1 else 1
    x2 = x.reshape(rows, n)

    # effective multiplier: s*log(N) (+ b), matching the PyTorch module
    scale_val = jnp.asarray(s, jnp.float32) * jnp.float32(math.log(n))
    if has_bias:
        scale_val = scale_val + jnp.asarray(b, jnp.float32)
    scale = scale_val.reshape(1, 1)

    vmem_limit, tile_budget = _vmem_budget()
    itemsize = x2.dtype.itemsize
    # footprint / row: 2x in + 2x out double buffers + ~3 full-tile f32 temps
    oneshot_bytes_per_row = n * (2 * itemsize + 2 * itemsize + 3 * 4)
    oneshot_rows_fit = tile_budget // max(1, oneshot_bytes_per_row)

    use_chunked = force_chunked or (n >= 1024 and oneshot_rows_fit < 128)
    if use_chunked and n >= 256:
        tn = n_chunk if n_chunk is not None else 2048
        tn = max(128, min(tn, (n // 128) * 128))
    else:
        use_chunked = False

    def _params(sem):
        return pltpu.CompilerParams(dimension_semantics=sem,
                                    vmem_limit_bytes=vmem_limit)

    if not use_chunked:
        # ---------------- one-shot path (whole row resident) ----------------
        tm = _pick_row_tile(rows, oneshot_bytes_per_row, tile_budget)
        out = pl.pallas_call(
            _ssmax_oneshot_kernel,
            out_shape=jax.ShapeDtypeStruct((rows, n), x2.dtype),
            grid_spec=pltpu.PrefetchScalarGridSpec(
                num_scalar_prefetch=0,
                grid=(pl.cdiv(rows, tm),),
                in_specs=[
                    pl.BlockSpec(memory_space=pltpu.SMEM),        # scale scalar
                    pl.BlockSpec((tm, n), lambda i: (i, 0)),      # x row-tile
                ],
                out_specs=pl.BlockSpec((tm, n), lambda i: (i, 0)),
            ),
            compiler_params=_params(("parallel",)),
        )(scale, x2)
    else:
        # ------------- chunked / online-softmax path (long-context N) -------
        chunk_bytes_per_row = tn * (2 * itemsize + 2 * itemsize + 3 * 4) + 64
        tm = _pick_row_tile(rows, chunk_bytes_per_row, tile_budget)
        grid_rows = pl.cdiv(rows, tm)
        n_chunks = pl.cdiv(n, tn)

        stats = functools.partial(_ssmax_stats_kernel, n_valid=n, chunk=tn)
        m_rows, l_rows = pl.pallas_call(
            stats,
            out_shape=(jax.ShapeDtypeStruct((rows, 1), jnp.float32),
                       jax.ShapeDtypeStruct((rows, 1), jnp.float32)),
            grid_spec=pltpu.PrefetchScalarGridSpec(
                num_scalar_prefetch=0,
                grid=(grid_rows, n_chunks),
                in_specs=[
                    pl.BlockSpec(memory_space=pltpu.SMEM),
                    pl.BlockSpec((tm, tn), lambda i, j: (i, j)),
                ],
                out_specs=[
                    pl.BlockSpec((tm, 1), lambda i, j: (i, 0)),
                    pl.BlockSpec((tm, 1), lambda i, j: (i, 0)),
                ],
            ),
            compiler_params=_params(("parallel", "arbitrary")),
        )(scale, x2)

        out = pl.pallas_call(
            _ssmax_apply_kernel,
            out_shape=jax.ShapeDtypeStruct((rows, n), x2.dtype),
            grid_spec=pltpu.PrefetchScalarGridSpec(
                num_scalar_prefetch=0,
                grid=(grid_rows, n_chunks),
                in_specs=[
                    pl.BlockSpec(memory_space=pltpu.SMEM),
                    pl.BlockSpec((tm, tn), lambda i, j: (i, j)),
                    pl.BlockSpec((tm, 1), lambda i, j: (i, 0)),
                    pl.BlockSpec((tm, 1), lambda i, j: (i, 0)),
                ],
                out_specs=pl.BlockSpec((tm, tn), lambda i, j: (i, j)),
            ),
            compiler_params=_params(("parallel", "parallel")),
        )(scale, x2, m_rows, l_rows)

    out = out.reshape(orig_shape)
    if axis != ndim - 1:
        out = jnp.moveaxis(out, -1, axis)
    return out


if __name__ == "__main__":
    # Deterministic parameters matching ScalableSoftmax defaults:
    #   s = 0.43 (learnable scalar in PyTorch; plain scalar here), bias = False
    s_param = 0.43
    key = jax.random.PRNGKey(0)
    k1, k2, k3 = jax.random.split(key, 3)

    # Attention-logit-like input: (batch=2, heads=4, seq=16, keys=128)
    x = jax.random.normal(k1, (2, 4, 16, 128), dtype=jnp.float32)
    y = jax.block_until_ready(scalable_softmax(x, s=s_param))
    y_ref = jax.nn.softmax(x * (s_param * math.log(x.shape[-1])), axis=-1)
    assert y.shape == x.shape and y.dtype == x.dtype
    assert jnp.allclose(y, y_ref, atol=1e-5, rtol=1e-5), "one-shot mismatch"

    # bias variant: b is added to the multiplier, matching the PyTorch module
    yb = jax.block_until_ready(scalable_softmax(x, s=s_param, b=0.25, has_bias=True))
    yb_ref = jax.nn.softmax(x * (s_param * math.log(x.shape[-1]) + 0.25), axis=-1)
    assert jnp.allclose(yb, yb_ref, atol=1e-5, rtol=1e-5), "bias mismatch"

    # chunked (online-softmax) path used for long-context N — exercised here at
    # a small scale by forcing 128-wide chunks
    x_long = jax.random.normal(k2, (48, 512), dtype=jnp.float32)
    yl = jax.block_until_ready(
        scalable_softmax(x_long, s=s_param, force_chunked=True, n_chunk=128))
    yl_ref = jax.nn.softmax(x_long * (s_param * math.log(512)), axis=-1)
    assert jnp.allclose(yl, yl_ref, atol=1e-5, rtol=1e-5), "chunked mismatch"

    # chunked path with N not a multiple of the chunk (tail-column masking)
    x_rag = jax.random.normal(k3, (40, 320), dtype=jnp.float32)
    yr = jax.block_until_ready(
        scalable_softmax(x_rag, s=s_param, force_chunked=True, n_chunk=128))
    yr_ref = jax.nn.softmax(x_rag * (s_param * math.log(320)), axis=-1)
    assert jnp.allclose(yr, yr_ref, atol=1e-5, rtol=1e-5), "masked-chunk mismatch"

    print("KERNEL_OK")
</pallas_src>

<mosaic_0001>
module attributes {stable_mosaic.version = 11 : i64} {
  func.func @_ssmax_oneshot_kernel(%arg0: i32, %arg1: memref<1x1xf32, #tpu.memory_space<smem>>, %arg2: memref<32x128xf32, #tpu.memory_space<vmem>>, %arg3: memref<32x128xf32, #tpu.memory_space<vmem>>) attributes {dimension_semantics = [#tpu.dimension_semantics<parallel>], iteration_bounds = array<i64: 4>, scalar_prefetch = 0 : i64, scratch_operands = 0 : i64, tpu.core_type = #tpu.core_type<tc>, window_params = [{transform_indices = @transform_0, window_bounds = array<i64: 1, 1>}, {transform_indices = @transform_1, window_bounds = array<i64: 32, 128>}, {transform_indices = @transform_2, window_bounds = array<i64: 32, 128>}]} {
    %c0 = arith.constant 0 : index
    %c0_0 = arith.constant 0 : index
    %0 = memref.load %arg1[%c0, %c0_0] : memref<1x1xf32, #tpu.memory_space<smem>>
    %c0_1 = arith.constant 0 : index
    %c0_2 = arith.constant 0 : index
    %1 = vector.load %arg2[%c0_1, %c0_2] : memref<32x128xf32, #tpu.memory_space<vmem>>, vector<32x128xf32>
    %cst = arith.constant dense<0xFF800000> : vector<32xf32>
    %2 = vector.multi_reduction <maximumf>, %1, %cst [1] : vector<32x128xf32> to vector<32xf32>
    %3 = vector.shape_cast %2 : vector<32xf32> to vector<32x1xf32>
    %cst_3 = arith.constant dense<0x7F800000> : vector<32xf32>
    %4 = vector.multi_reduction <minimumf>, %1, %cst_3 [1] : vector<32x128xf32> to vector<32xf32>
    %5 = vector.shape_cast %4 : vector<32xf32> to vector<32x1xf32>
    %cst_4 = arith.constant 0.000000e+00 : f32
    %6 = arith.cmpf oge, %0, %cst_4 : f32
    %7 = arith.select %6, %3, %5 : vector<32x1xf32>
    %8 = vector.broadcast %7 : vector<32x1xf32> to vector<32x128xf32>
    %9 = arith.subf %1, %8 : vector<32x128xf32>
    %10 = vector.broadcast %0 : f32 to vector<32x128xf32>
    %11 = arith.mulf %9, %10 : vector<32x128xf32>
    %12 = math.exp %11 : vector<32x128xf32>
    %cst_5 = arith.constant dense<0.000000e+00> : vector<32xf32>
    %13 = vector.multi_reduction <add>, %12, %cst_5 [1] : vector<32x128xf32> to vector<32xf32>
    %14 = vector.shape_cast %13 : vector<32xf32> to vector<32x1xf32>
    %15 = tpu.reciprocal %14 {approx = true} : vector<32x1xf32> -> vector<32x1xf32>
    %16 = arith.mulf %14, %15 : vector<32x1xf32>
    %cst_6 = arith.constant 2.000000e+00 : f32
    %17 = vector.broadcast %cst_6 : f32 to vector<32x1xf32>
    %18 = arith.subf %17, %16 : vector<32x1xf32>
    %19 = arith.mulf %15, %18 : vector<32x1xf32>
    %20 = vector.broadcast %19 : vector<32x1xf32> to vector<32x128xf32>
    %21 = arith.mulf %12, %20 : vector<32x128xf32>
    %c0_7 = arith.constant 0 : index
    %c0_8 = arith.constant 0 : index
    %22 = vector.load %arg3[%c0_7, %c0_8] : memref<32x128xf32, #tpu.memory_space<vmem>>, vector<32x128xf32>
    tpu.vector_store %arg3[%c0_7, %c0_8], %21 {strides = array<i32>} : memref<32x128xf32, #tpu.memory_space<vmem>>, vector<32x128xf32>,
    return
  }
  func.func @transform_0(%arg0: i32) -> (i32, i32) {
    %c0_i32 = arith.constant 0 : i32
    %c0_i32_0 = arith.constant 0 : i32
    %c0_i32_1 = arith.constant 0 : i32
    return %c0_i32, %c0_i32_0 : i32, i32
  }
  func.func @transform_1(%arg0: i32) -> (i32, i32) {
    %c0_i32 = arith.constant 0 : i32
    %c0_i32_0 = arith.constant 0 : i32
    return %arg0, %c0_i32 : i32, i32
  }
  func.func @transform_2(%arg0: i32) -> (i32, i32) {
    %c0_i32 = arith.constant 0 : i32
    %c0_i32_0 = arith.constant 0 : i32
    return %arg0, %c0_i32 : i32, i32
  }
}

</mosaic_0001>

<bundles_post_ra>
// kernel: tpu_custom_call.1
= control target key start
LH: loop header
LB: loop body
LE: loop exit
PB: predicated region body
PF: predicated region fallthrough
CT: control target
= control target key end

     0   :  { %s677_s0 = inlined_call_operand.<no memory space> [shape: f32[1,1], index: 0, kind: input, shape index: {}]   ;;  %s678_s1 = inlined_call_operand.hbm [shape: f32[128,128], index: 1, kind: input, shape index: {}]   ;;  %s679_s2 = inlined_call_operand.hbm [shape: f32[128,128], index: 2, kind: output, shape index: {}]  }
   0x1   :  { %7 = sst [smem:[#allocation2]] %s677_s0 }
   0x2   :  { %8 = vsyncpa [#allocation4], 0 }
   0x3   :  { %10 = vsyncpa [#allocation4 + $0x1], 0 }
   0x4   :  { %11 = vsyncpa [#allocation5], 0 }
   0x5   :  { %13 = vsyncpa [#allocation5 + $0x1], 0  ;;  %s536_s11 = smov 0   ;;  %s538_s12 = smov 0  }
   0x6   :  { %s540_s13 = smov 0   ;;  %s542_s14 = smov 0  }
   0x7 LB: > { %s557_s0 = sadd.s32 4294967295, %s512_s14   ;;  %s334_s15 = sadd.s32 4294967294, %s512_s14   ;;  %s512_s14 = sphi %s542_s14, %s690_s14   ;;  %s508_s13 = sphi %s540_s13, %s689_s13   ;;  %s504_s12 = sphi %s538_s12, %s688_s12   ;;  %s500_s11 = sphi %s536_s11, %s687_s11  }
   0x8   : > { %s561_s16 = sadd.s32 1, %s512_s14   ;;  %s47_s17 = sadd.s32 1, %s508_s13 }
   0x9   : > { %s44_s18 = ssub.s32 %s512_s14, %s561_s16  ;;  %p54_p0 = scmp.ne.s32.totalorder %s508_s13, %s504_s12 }
   0xa   : > { %p45_p1 = scmp.eq.s32.totalorder %s44_s18, 0  ;;  %p55_p2 = scmp.eq.s32.totalorder %s512_s14, 0 }
   0xb   : > { %p60_p3 = scmp.ne.s32.totalorder %s504_s12, %s500_s11  ;;  %p61_p4 = scmp.eq.s32.totalorder %s557_s0, 0 }
   0xc   : > { %s573_s19 = scalar_select %p45_p1, %s508_s13, %s47_s17  }
   0xd   : > { %p575_p5 = por %p55_p2, %p54_p0  ;;  %p579_p6 = por %p61_p4, %p60_p3 }
   0xe   : > { %p84_p7 = scmp.eq.s32.totalorder %s557_s0, 3  ;;  %p90_p8 = scmp.eq.s32.totalorder %s334_s15, 3 }
   0xf   : > { %p362_p9 = scmp.lt.s32.totalorder %s512_s14, 4  ;;  %s113_s24 = sand.u32 1, %s508_s13  }
  0x10   : > { %p585_p10 = por %p84_p7, %p54_p0  ;;  %p589_p11 = por %p90_p8, %p60_p3 }
  0x11   : > { %s348_s25 = sshll.u32 %s512_s14, 5  ;;  %s337_s26 = sshll.u32 %s113_s24, 5 }
  0x12   : > { %s122_s29 = scalar_lea.hbm %s678_s1, %s348_s25  ;;  %s117_s3 = scalar_lea.vmem [#allocation3], %s337_s26 }
  0x13   : > { %s123_s30 = sshll.u32 %s122_s29, 4  ;;  %s125_s4 = sshll.u32 %s117_s3, 4  ;;  %s124_s30 = int_to_ptr.hbm [resolvable:$true] %s123_s30  ;;  %s126_s4 = int_to_ptr.vmem [resolvable:$true] %s125_s4 }
  0x14   : > { %p600_p12 = pnand %p362_p9, %p575_p5  ;;  %p340_p13 = scmp.ge.s32.totalorder %s512_s14, 1 }
  0x15   : > { %p133_p0 = scmp.lt.s32.totalorder %s512_s14, 5  ;;  %s114_s6 = scalar_lea.sflag [#allocation4], %s113_s24 }
  0x16   : > { %s416_s7 = sshra.s32 %s124_s30, 4  ;;  %p420_p2 = pneg %p600_p12  ;;  %s417_s7 = int_to_ptr.hbm [resolvable:$true] %s416_s7 }
  0x17   : > { %s418_s8 = scalar_lea.hbm %s417_s7, 32  ;;  %s423_s15 = scalar_lea.hbm %s678_s1, 128 }
  0x18   : > { %p419_p1 = scmp.ne.s32.totalorder %s417_s7, %s418_s8  ;;  %p424_p5 = scmp.lt.s32.totalorder %s417_s7, %s678_s1 }
  0x19   : > { %p425_p7 = scmp.lt.s32.totalorder %s423_s15, %s418_s8 }
  0x1a   : > { %p421_p3 = pnand %p420_p2, %p419_p1 }
  0x1b   : > { %p426_p8 = por %p425_p7, %p424_p5 }
  0x1c   : > { %p422_p4 = pneg %p421_p3 }
  0x1e   : > { %p427_p9 = pnand %p426_p8, %p422_p4 }
  0x20   : > { %430 = shalt.err (!%p427_p9)
}
  0x21   : > { %s514_s20 = smov 128   ;;  %s515_s24 = smov 8  }
  0x22   : > { %357 = dma.hbm_to_vmem [thread:$0]  (!%p600_p12), %s124_s30, 512, %s126_s4, %s114_s6, %s514_s20, %s514_s20, %s515_s24  }
  0x23   : > { %p134_p1 = pnand %p340_p13, %p133_p0 }
  0x24   : > { %s621_s25 = sand.u32 (!%p134_p1), 1, %s504_s12  }
  0x25   : > { %137 = sbr.rel (%p134_p1) target bundleno = 326 (0x146), region = 28  ;;  %s341_s26 = sshll.u32 (!%p134_p1), %s621_s25, 5 }
  0x26   : > { %s140_s27 = scalar_lea.sflag (!%p134_p1), [#allocation4], %s621_s25  ;;  %s143_s28 = scalar_lea.vmem (!%p134_p1), [#allocation3], %s341_s26 }
  0x2a   : > { %491 = dma.done.wait (%p579_p6), %s140_s27, 512  }
  0x2b   : > { %493 = vsyncadd (%p579_p6), %s140_s27, 4294966784  ;;  %v170_v0 = vld [vmem:[%s143_s28 + $0x10] sm:$0xff]  ;;  %v168_v1 = vld [vmem:[%s143_s28] sm:$0xff]  ;;  %s167_s29 = sld [smem:[#allocation2]]  ;;  %s164_s21 = scalar_lea.vmem [#allocation6], %s341_s26 }
  0x2c   : > { %176 = vmax.xlane.f32.xlu1 %v170_v0  ;;  %180 = vmin.xlane.f32.xlu2 %v168_v1  ;;  %v171_v2 = vld [vmem:[%s143_s28 + $0x18] sm:$0xff]  ;;  %v169_v3 = vld [vmem:[%s143_s28 + $0x8] sm:$0xff]  ;;  %s349_s3 = sshll.u32 %s557_s0, 5  ;;  %s258_s7 = sshll.u32 %s164_s21, 4  ;;  %s259_s7 = int_to_ptr.vmem [resolvable:$true] %s258_s7 }
  0x2d   : > { %172 = vmax.xlane.f32.xlu0 %v168_v1  ;;  %s257_s6 = scalar_lea.hbm %s679_s2, %s349_s3  ;;  %s246_s0 = scalar_lea.sflag [#allocation5], %s621_s25 }
  0x2e   : > { %s260_s8 = sshll.u32 %s257_s6, 4  ;;  %s466_s18 = scalar_lea.hbm %s679_s2, 128  ;;  %s261_s8 = int_to_ptr.hbm [resolvable:$true] %s260_s8 }
  0x2f   : > { %s460_s9 = sshra.s32 %s261_s8, 4  ;;  %s461_s9 = int_to_ptr.hbm [resolvable:$true] %s460_s9 }
  0x30   : > { %s462_s10 = scalar_lea.hbm %s461_s9, 32  ;;  %p467_p2 = scmp.lt.s32.totalorder %s461_s9, %s679_s2 }
  0x31   : > { %p188_p12 = scmp.ge.f32.partialorder %s167_s29, 0.0  ;;  %v200_v10 = vstv %s167_s29  ;;  %p463_p6 = scmp.ne.s32.totalorder %s461_s9, %s462_s10 }
  0x32   : > { %p468_p3 = scmp.lt.s32.totalorder %s466_s18, %s462_s10 }
  0x33   : > { %s189_s30 = scalar_select %p188_p12, 1, 0 }
  0x34   : > { %178 = vmax.xlane.f32.xlu1 %v171_v2  ;;  %182 = vmin.xlane.f32.xlu2 %v169_v3  ;;  %p464_p13 = pnand %p463_p6, %p585_p10  ;;  %p469_p4 = por %p468_p3, %p467_p2 }
  0x35   : > { %174 = vmax.xlane.f32.xlu0 %v169_v3  ;;  %v190_v4 = vstv %s189_s30 }
  0x36   : > { %vm631_vm0 = vcmp.eq.s32.totalorder %v190_v4, 1  ;;  %p465_p0 = pneg %p464_p13 }
  0x38   : > { %p470_p5 = pnand %p469_p4, %p465_p0 }
  0x3c   : > { %186 = vmin.xlane.f32.xlu1 %v171_v2 }
  0x3d   : > { %184 = vmin.xlane.f32.xlu0 %v170_v0 }
  0x9f   : > { %v177_v6 = vpop.xlane.xlu1 %176  ;;  %v181_v7 = vpop.xlane.xlu2 %180 }
  0xa0   : > { %v173_v8 = vpop.xlane.xlu0 %172 }
  0xa1   : > { %v192_v9 = vsel %vm631_vm0, %v173_v8, %v181_v7 }
  0xa2   : > { %v196_v11 = vsub.f32 %v168_v1, %v192_v9 }
  0xa4   : > { %v201_v12 = vmul.f32 %v200_v10, %v196_v11 }
  0xa6   : > { %v205_v13 = vmul.f32 1.442695, %v201_v12 }
  0xa7   : > { %v179_v14 = vpop.xlane.xlu1 %178  ;;  %v183_v15 = vpop.xlane.xlu2 %182 }
  0xa8   : > { %400 = vpow2.f32 %v205_v13  ;;  %v175_v16 = vpop.xlane.xlu0 %174 }
  0xa9   : > { %v193_v17 = vsel %vm631_vm0, %v175_v16, %v183_v15 }
  0xaa   : > { %v197_v18 = vsub.f32 %v169_v3, %v193_v17 }
  0xac   : > { %v202_v19 = vmul.f32 %v200_v10, %v197_v18 }
  0xae   : > { %v401_v20 = vpop.eup %400  ;;  %v207_v21 = vmul.f32 1.442695, %v202_v19 }
  0xaf   : > { %213 = vadd.xlane.f32.xlu2 %v401_v20  ;;  %v187_v22 = vpop.xlane.xlu1 %186 }
  0xb0   : > { %402 = vpow2.f32 %v207_v21  ;;  %v195_v23 = vsel %vm631_vm0, %v179_v14, %v187_v22  ;;  %v185_v24 = vpop.xlane.xlu0 %184 }
  0xb1   : > { %v199_v25 = vsub.f32 %v171_v2, %v195_v23  ;;  %v194_v26 = vsel %vm631_vm0, %v177_v6, %v185_v24 }
  0xb2   : > { %v198_v27 = vsub.f32 %v170_v0, %v194_v26 }
  0xb3   : > { %v204_v28 = vmul.f32 %v200_v10, %v199_v25 }
  0xb4   : > { %v203_v29 = vmul.f32 %v200_v10, %v198_v27 }
  0xb5   : > { %v211_v30 = vmul.f32 1.442695, %v204_v28 }
  0xb6   : > { %v403_v31 = vpop.eup %402  ;;  %v209_v32 = vmul.f32 1.442695, %v203_v29 }
  0xb7   : > { %404 = vpow2.f32 %v211_v30  ;;  %215 = vadd.xlane.f32.xlu0 %v403_v31 }
  0xb8   : > { %406 = vpow2.f32 %v209_v32 }
  0xbd   : > { %v405_v33 = vpop.eup %404 }
  0xbe   : > { %v407_v34 = vpop.eup %406  ;;  %219 = vadd.xlane.f32.xlu2 %v405_v33 }
  0xbf   : > { %217 = vadd.xlane.f32.xlu1 %v407_v34 }
 0x122   : > { %v214_v35 = vpop.xlane.xlu2 %213 }
 0x123   : > { %408 = vrcp.f32 %v214_v35 }
 0x129   : > { %v409_v36 = vpop.eup %408 }
 0x12a   : > { %v225_v37 = vmul.f32 %v409_v36, %v214_v35  ;;  %v216_v38 = vpop.xlane.xlu0 %215 }
 0x12b   : > { %410 = vrcp.f32 %v216_v38 }
 0x12c   : > { %v229_v39 = vsub.f32 2.0, %v225_v37 }
 0x12e   : > { %v233_v40 = vmul.f32 %v409_v36, %v229_v39 }
 0x130   : > { %v237_v41 = vmul.f32 %v401_v20, %v233_v40 }
 0x131   : > { %v411_v42 = vpop.eup %410  ;;  %v220_v43 = vpop.xlane.xlu2 %219 }
 0x132   : > { %241 = vst [vmem:[%s164_s21] sm:$0xff] %v237_v41  ;;  %v226_v44 = vmul.f32 %v411_v42, %v216_v38  ;;  %v218_v45 = vpop.xlane.xlu1 %217  ;;  %412 = vrcp.f32 %v220_v43 }
 0x133   : > { %414 = vrcp.f32 %v218_v45 }
 0x134   : > { %v230_v46 = vsub.f32 2.0, %v226_v44 }
 0x136   : > { %v234_v47 = vmul.f32 %v411_v42, %v230_v46 }
 0x138   : > { %v413_v48 = vpop.eup %412  ;;  %v238_v49 = vmul.f32 %v403_v31, %v234_v47 }
 0x139   : > { %v415_v50 = vpop.eup %414  ;;  %v228_v51 = vmul.f32 %v413_v48, %v220_v43 }
 0x13a   : > { %242 = vst [vmem:[%s164_s21 + $0x8] sm:$0xff] %v238_v49  ;;  %v227_v52 = vmul.f32 %v415_v50, %v218_v45 }
 0x13b   : > { %v232_v53 = vsub.f32 2.0, %v228_v51 }
 0x13c   : > { %v231_v54 = vsub.f32 2.0, %v227_v52 }
 0x13d   : > { %v236_v55 = vmul.f32 %v413_v48, %v232_v53 }
 0x13e   : > { %v235_v56 = vmul.f32 %v415_v50, %v231_v54 }
 0x13f   : > { %v240_v57 = vmul.f32 %v405_v33, %v236_v55 }
 0x140   : > { %v239_v58 = vmul.f32 %v407_v34, %v235_v56 }
 0x141   : > { %244 = vst [vmem:[%s164_s21 + $0x18] sm:$0xff] %v240_v57 }
 0x142   : > { %243 = vst [vmem:[%s164_s21 + $0x10] sm:$0xff] %v239_v58 }
 0x143   : > { %473 = shalt.err (!%p470_p5)
}
 0x144   : > { %s516_s25 = smov 128   ;;  %s517_s26 = smov 8  }
 0x145   : > { %352 = dma.vmem_to_hbm [thread:$0]  (%p585_p10), %s259_s7, 512, %s261_s8, %s246_s0, %s516_s25, %s516_s25, %s517_s26  }
 0x146 PF: > { %p363_p7 = scmp.ge.s32.totalorder %s512_s14, 2  ;;  %s275_s27 = sand.u32 1, %s500_s11  }
 0x147   : > { %s276_s28 = scalar_lea.sflag [#allocation5], %s275_s27 }
 0x148   : > { %p359_p8 = pnand %p363_p7, %p589_p11 }
 0x14a   : > { %p360_p9 = pneg %p359_p8 }
 0x14c   : > { %495 = dma.done.wait (%p360_p9), %s276_s28, 512  }
 0x14d   : > { %497 = vsyncadd (%p360_p9), %s276_s28, 4294966784  ;;  %p16_p1 = scmp.ge.s32.totalorder %s561_s16, 6   ;;  %s687_s11 = smov %s504_s12 }
 0x14e   : > { %s688_s12 = smov %s508_s13  ;;  %s689_s13 = smov %s573_s19 }
 0x14f   : > { %s690_s14 = smov %s561_s16  ;;  %18 = sbr.rel (!%p16_p1) target bundleno = 7 (0x7), region = 73 }
 0x154   :  { %282 = vsyncpa [#allocation4], 1 }
 0x155   :  { %284 = vsyncpa [#allocation4 + $0x1], 1 }
 0x156   :  { %285 = vsyncpa [#allocation5], 1 }
 0x157   :  { %287 = vsyncpa [#allocation5 + $0x1], 1 }

</bundles_post_ra>
